<compile_context>
chip_gen: v5e
topology: v5e:2x2
jax: 0.10.0
libtpu: 0.0.40
codegen_flags: <defaults>
</compile_context>

<pallas_src>
import jax
import jax.numpy as jnp
from jax.experimental import pallas as pl
from jax.experimental.pallas import tpu as pltpu

LATENT_DIM = 4


def _round_up(n, m):
    return ((n + m - 1) // m) * m


def _mlp_kernel(x_ref,
                w1, b1, w2, b2, w3, b3, w4, b4, w5, b5, w6, b6,
                recon_ref, latent_ref):
    """All six Linear(+ReLU) stages fused; one invocation per batch tile."""
    mm = w1.dtype  # matmul operand dtype (bf16 fast path or f32)

    def lin(h, w_ref, b_ref):
        # MXU matmul with f32 accumulation; bias-add / ReLU stay in f32.
        return jnp.dot(h.astype(mm), w_ref[...],
                       preferred_element_type=jnp.float32) + b_ref[...]

    x = x_ref[...]                                   # single cast happens inside lin()
    h = jnp.maximum(lin(x, w1, b1), 0.0)             # (tile, 128)
    h = jnp.maximum(lin(h, w2, b2), 0.0)             # (tile, 64)
    lat = jnp.maximum(lin(h, w3, b3), 0.0)           # (tile, 4), f32
    h = jnp.maximum(lin(lat, w4, b4), 0.0)           # (tile, 64)
    h = jnp.maximum(lin(h, w5, b5), 0.0)             # (tile, 128)
    out = lin(h, w6, b6)                             # (tile, C)

    recon_ref[...] = out.astype(recon_ref.dtype)
    latent_ref[...] = lat.astype(latent_ref.dtype)


def _choose_tile(B, batch_tile):
    if B <= 8:
        return max(B, 1)
    req = _round_up(max(batch_tile, 8), 8)
    # Guarantee >= 2 grid steps whenever the batch can be split, so the
    # "parallel" axis shards across both TensorCores on v7x (no-op on v5e/v6e).
    half = _round_up((B + 1) // 2, 8)
    return max(8, min(req, half))


def refine_model_relu(x, params, *, batch_tile=2048, use_bf16=True):
    """x: (B, in_channels) float32.

    params: dict of (in, out) weights `w1..w6` and (1, out) biases `b1..b6`.
    Returns (reconstruction (B, in_channels) in x.dtype, latent (B, 4) float32).
    """
    B, C = x.shape
    mm_dtype = jnp.bfloat16 if use_bf16 else jnp.float32

    wbs = []
    for i in range(1, 7):
        wbs.append(params[f"w{i}"].astype(mm_dtype))
        wbs.append(params[f"b{i}"].astype(jnp.float32))

    tile = _choose_tile(B, batch_tile)
    grid = (pl.cdiv(B, tile),)

    in_specs = [pl.BlockSpec((tile, C), lambda i: (i, 0))]
    for arr in wbs:
        # Full (untiled) weight/bias block; constant index_map -> stays resident
        # in VMEM, DMA'd only once across the whole grid.
        in_specs.append(pl.BlockSpec(arr.shape, lambda i: (0, 0)))

    out_specs = (pl.BlockSpec((tile, C), lambda i: (i, 0)),
                 pl.BlockSpec((tile, LATENT_DIM), lambda i: (i, 0)))
    out_shape = (jax.ShapeDtypeStruct((B, C), x.dtype),
                 jax.ShapeDtypeStruct((B, LATENT_DIM), jnp.float32))

    recon, latent = pl.pallas_call(
        _mlp_kernel,
        grid_spec=pltpu.PrefetchScalarGridSpec(
            num_scalar_prefetch=0,
            grid=grid,
            in_specs=in_specs,
            out_specs=out_specs,
        ),
        out_shape=out_shape,
        compiler_params=pltpu.CompilerParams(
            # Batch tiles are independent -> shard across TensorCores on v7x.
            dimension_semantics=("parallel",),
        ),
    )(x, *wbs)
    return recon, latent


def init_params(key, in_channels):
    """Deterministic synthetic parameters. Weights (in, out), biases (1, out)."""
    dims = [in_channels, 128, 64, LATENT_DIM, 64, 128, in_channels]
    params = {}
    for i in range(6):
        key, kw, kb = jax.random.split(key, 3)
        fan_in = dims[i]
        bound = 1.0 / jnp.sqrt(fan_in)
        params[f"w{i + 1}"] = jax.random.uniform(
            kw, (dims[i], dims[i + 1]), jnp.float32, -bound, bound)
        params[f"b{i + 1}"] = jax.random.uniform(
            kb, (1, dims[i + 1]), jnp.float32, -bound, bound)
    return params


def reference_forward(x, params, use_bf16=False):
    mm = jnp.bfloat16 if use_bf16 else jnp.float32

    def lin(h, w, b):
        return jnp.dot(h.astype(mm), w.astype(mm),
                       preferred_element_type=jnp.float32) + b

    h = jnp.maximum(lin(x, params["w1"], params["b1"]), 0.0)
    h = jnp.maximum(lin(h, params["w2"], params["b2"]), 0.0)
    lat = jnp.maximum(lin(h, params["w3"], params["b3"]), 0.0)
    h = jnp.maximum(lin(lat, params["w4"], params["b4"]), 0.0)
    h = jnp.maximum(lin(h, params["w5"], params["b5"]), 0.0)
    out = lin(h, params["w6"], params["b6"])
    return out, lat


if __name__ == "__main__":
    in_channels = 32

    key = jax.random.PRNGKey(0)
    key, kx = jax.random.split(key)
    params = init_params(key, in_channels)

    # (batch, batch_tile, use_bf16, tol)
    #  - B=8:  single grid step, all-f32, tight tolerance.
    #  - B=20, tile=8: 3-step grid with a ragged last tile (no wrapper pad/slice),
    #          bf16 MXU fast path.
    #  - B=20, default tile: tile capped at 16 -> 2-step grid (v7x megacore split), f32.
    cases = [(8, 2048, False, 1e-5),
             (20, 8, True, 2e-2),
             (20, 2048, False, 1e-5)]
    for batch, batch_tile, use_bf16, tol in cases:
        kcase = jax.random.fold_in(kx, batch * 131 + batch_tile)
        x = jax.random.normal(kcase, (batch, in_channels), jnp.float32)

        out, latent = refine_model_relu(
            x, params, batch_tile=batch_tile, use_bf16=use_bf16)
        out = jax.block_until_ready(out)
        latent = jax.block_until_ready(latent)

        ref_out, ref_lat = reference_forward(x, params, use_bf16=use_bf16)
        assert out.shape == (batch, in_channels)
        assert latent.shape == (batch, LATENT_DIM)
        assert jnp.allclose(out, ref_out, atol=tol, rtol=tol), \
            float(jnp.max(jnp.abs(out - ref_out)))
        assert jnp.allclose(latent, ref_lat, atol=tol, rtol=tol), \
            float(jnp.max(jnp.abs(latent - ref_lat)))

    print("KERNEL_OK")
</pallas_src>

<mosaic_0001>
module attributes {stable_mosaic.version = 11 : i64} {
  func.func @_mlp_kernel(%arg0: i32, %arg1: memref<8x32xf32, #tpu.memory_space<vmem>>, %arg2: memref<32x128xf32, #tpu.memory_space<vmem>>, %arg3: memref<1x128xf32, #tpu.memory_space<vmem>>, %arg4: memref<128x64xf32, #tpu.memory_space<vmem>>, %arg5: memref<1x64xf32, #tpu.memory_space<vmem>>, %arg6: memref<64x4xf32, #tpu.memory_space<vmem>>, %arg7: memref<1x4xf32, #tpu.memory_space<vmem>>, %arg8: memref<4x64xf32, #tpu.memory_space<vmem>>, %arg9: memref<1x64xf32, #tpu.memory_space<vmem>>, %arg10: memref<64x128xf32, #tpu.memory_space<vmem>>, %arg11: memref<1x128xf32, #tpu.memory_space<vmem>>, %arg12: memref<128x32xf32, #tpu.memory_space<vmem>>, %arg13: memref<1x32xf32, #tpu.memory_space<vmem>>, %arg14: memref<8x32xf32, #tpu.memory_space<vmem>>, %arg15: memref<8x4xf32, #tpu.memory_space<vmem>>) attributes {dimension_semantics = [#tpu.dimension_semantics<parallel>], iteration_bounds = array<i64: 1>, scalar_prefetch = 0 : i64, scratch_operands = 0 : i64, tpu.core_type = #tpu.core_type<tc>, window_params = [{transform_indices = @transform_0, window_bounds = array<i64: 8, 32>}, {pipeline_mode = #tpu.pipeline_mode<synchronous>, transform_indices = @transform_1, window_bounds = array<i64: 32, 128>}, {pipeline_mode = #tpu.pipeline_mode<synchronous>, transform_indices = @transform_2, window_bounds = array<i64: 1, 128>}, {pipeline_mode = #tpu.pipeline_mode<synchronous>, transform_indices = @transform_3, window_bounds = array<i64: 128, 64>}, {pipeline_mode = #tpu.pipeline_mode<synchronous>, transform_indices = @transform_4, window_bounds = array<i64: 1, 64>}, {pipeline_mode = #tpu.pipeline_mode<synchronous>, transform_indices = @transform_5, window_bounds = array<i64: 64, 4>}, {pipeline_mode = #tpu.pipeline_mode<synchronous>, transform_indices = @transform_6, window_bounds = array<i64: 1, 4>}, {pipeline_mode = #tpu.pipeline_mode<synchronous>, transform_indices = @transform_7, window_bounds = array<i64: 4, 64>}, {pipeline_mode = #tpu.pipeline_mode<synchronous>, transform_indices = @transform_8, window_bounds = array<i64: 1, 64>}, {pipeline_mode = #tpu.pipeline_mode<synchronous>, transform_indices = @transform_9, window_bounds = array<i64: 64, 128>}, {pipeline_mode = #tpu.pipeline_mode<synchronous>, transform_indices = @transform_10, window_bounds = array<i64: 1, 128>}, {pipeline_mode = #tpu.pipeline_mode<synchronous>, transform_indices = @transform_11, window_bounds = array<i64: 128, 32>}, {pipeline_mode = #tpu.pipeline_mode<synchronous>, transform_indices = @transform_12, window_bounds = array<i64: 1, 32>}, {transform_indices = @transform_13, window_bounds = array<i64: 8, 32>}, {transform_indices = @transform_14, window_bounds = array<i64: 8, 4>}]} {
    %c0 = arith.constant 0 : index
    %c0_0 = arith.constant 0 : index
    %0 = vector.load %arg1[%c0, %c0_0] : memref<8x32xf32, #tpu.memory_space<vmem>>, vector<8x32xf32>
    %c0_1 = arith.constant 0 : index
    %c0_2 = arith.constant 0 : index
    %1 = vector.load %arg2[%c0_1, %c0_2] : memref<32x128xf32, #tpu.memory_space<vmem>>, vector<32x128xf32>
    %cst = arith.constant dense<0.000000e+00> : vector<8x128xf32>
    %2 = tpu.matmul %0, %1, %cst {dimension_numbers = #tpu.dot_dimension_numbers<[1], [0], [0], [1], [0, 0, 1, 1], [], []>} : vector<8x32xf32>, vector<32x128xf32>, vector<8x128xf32> -> vector<8x128xf32>
    %c0_3 = arith.constant 0 : index
    %c0_4 = arith.constant 0 : index
    %3 = vector.load %arg3[%c0_3, %c0_4] : memref<1x128xf32, #tpu.memory_space<vmem>>, vector<1x128xf32>
    %4 = vector.broadcast %3 : vector<1x128xf32> to vector<8x128xf32>
    %5 = arith.addf %2, %4 : vector<8x128xf32>
    %cst_5 = arith.constant 0.000000e+00 : f32
    %6 = vector.broadcast %cst_5 : f32 to vector<8x128xf32>
    %7 = arith.maximumf %5, %6 : vector<8x128xf32>
    %c0_6 = arith.constant 0 : index
    %c0_7 = arith.constant 0 : index
    %8 = vector.load %arg4[%c0_6, %c0_7] : memref<128x64xf32, #tpu.memory_space<vmem>>, vector<128x64xf32>
    %cst_8 = arith.constant dense<0.000000e+00> : vector<8x64xf32>
    %9 = tpu.matmul %7, %8, %cst_8 {dimension_numbers = #tpu.dot_dimension_numbers<[1], [0], [0], [1], [0, 0, 1, 1], [], []>} : vector<8x128xf32>, vector<128x64xf32>, vector<8x64xf32> -> vector<8x64xf32>
    %c0_9 = arith.constant 0 : index
    %c0_10 = arith.constant 0 : index
    %10 = vector.load %arg5[%c0_9, %c0_10] : memref<1x64xf32, #tpu.memory_space<vmem>>, vector<1x64xf32>
    %11 = vector.broadcast %10 : vector<1x64xf32> to vector<8x64xf32>
    %12 = arith.addf %9, %11 : vector<8x64xf32>
    %cst_11 = arith.constant 0.000000e+00 : f32
    %13 = vector.broadcast %cst_11 : f32 to vector<8x64xf32>
    %14 = arith.maximumf %12, %13 : vector<8x64xf32>
    %c0_12 = arith.constant 0 : index
    %c0_13 = arith.constant 0 : index
    %15 = vector.load %arg6[%c0_12, %c0_13] : memref<64x4xf32, #tpu.memory_space<vmem>>, vector<64x4xf32>
    %cst_14 = arith.constant dense<0.000000e+00> : vector<8x4xf32>
    %16 = tpu.matmul %14, %15, %cst_14 {dimension_numbers = #tpu.dot_dimension_numbers<[1], [0], [0], [1], [0, 0, 1, 1], [], []>} : vector<8x64xf32>, vector<64x4xf32>, vector<8x4xf32> -> vector<8x4xf32>
    %c0_15 = arith.constant 0 : index
    %c0_16 = arith.constant 0 : index
    %17 = vector.load %arg7[%c0_15, %c0_16] : memref<1x4xf32, #tpu.memory_space<vmem>>, vector<1x4xf32>
    %18 = vector.broadcast %17 : vector<1x4xf32> to vector<8x4xf32>
    %19 = arith.addf %16, %18 : vector<8x4xf32>
    %cst_17 = arith.constant 0.000000e+00 : f32
    %20 = vector.broadcast %cst_17 : f32 to vector<8x4xf32>
    %21 = arith.maximumf %19, %20 : vector<8x4xf32>
    %c0_18 = arith.constant 0 : index
    %c0_19 = arith.constant 0 : index
    %22 = vector.load %arg8[%c0_18, %c0_19] : memref<4x64xf32, #tpu.memory_space<vmem>>, vector<4x64xf32>
    %cst_20 = arith.constant dense<0.000000e+00> : vector<8x64xf32>
    %23 = tpu.matmul %21, %22, %cst_20 {dimension_numbers = #tpu.dot_dimension_numbers<[1], [0], [0], [1], [0, 0, 1, 1], [], []>} : vector<8x4xf32>, vector<4x64xf32>, vector<8x64xf32> -> vector<8x64xf32>
    %c0_21 = arith.constant 0 : index
    %c0_22 = arith.constant 0 : index
    %24 = vector.load %arg9[%c0_21, %c0_22] : memref<1x64xf32, #tpu.memory_space<vmem>>, vector<1x64xf32>
    %25 = vector.broadcast %24 : vector<1x64xf32> to vector<8x64xf32>
    %26 = arith.addf %23, %25 : vector<8x64xf32>
    %cst_23 = arith.constant 0.000000e+00 : f32
    %27 = vector.broadcast %cst_23 : f32 to vector<8x64xf32>
    %28 = arith.maximumf %26, %27 : vector<8x64xf32>
    %c0_24 = arith.constant 0 : index
    %c0_25 = arith.constant 0 : index
    %29 = vector.load %arg10[%c0_24, %c0_25] : memref<64x128xf32, #tpu.memory_space<vmem>>, vector<64x128xf32>
    %cst_26 = arith.constant dense<0.000000e+00> : vector<8x128xf32>
    %30 = tpu.matmul %28, %29, %cst_26 {dimension_numbers = #tpu.dot_dimension_numbers<[1], [0], [0], [1], [0, 0, 1, 1], [], []>} : vector<8x64xf32>, vector<64x128xf32>, vector<8x128xf32> -> vector<8x128xf32>
    %c0_27 = arith.constant 0 : index
    %c0_28 = arith.constant 0 : index
    %31 = vector.load %arg11[%c0_27, %c0_28] : memref<1x128xf32, #tpu.memory_space<vmem>>, vector<1x128xf32>
    %32 = vector.broadcast %31 : vector<1x128xf32> to vector<8x128xf32>
    %33 = arith.addf %30, %32 : vector<8x128xf32>
    %cst_29 = arith.constant 0.000000e+00 : f32
    %34 = vector.broadcast %cst_29 : f32 to vector<8x128xf32>
    %35 = arith.maximumf %33, %34 : vector<8x128xf32>
    %c0_30 = arith.constant 0 : index
    %c0_31 = arith.constant 0 : index
    %36 = vector.load %arg12[%c0_30, %c0_31] : memref<128x32xf32, #tpu.memory_space<vmem>>, vector<128x32xf32>
    %cst_32 = arith.constant dense<0.000000e+00> : vector<8x32xf32>
    %37 = tpu.matmul %35, %36, %cst_32 {dimension_numbers = #tpu.dot_dimension_numbers<[1], [0], [0], [1], [0, 0, 1, 1], [], []>} : vector<8x128xf32>, vector<128x32xf32>, vector<8x32xf32> -> vector<8x32xf32>
    %c0_33 = arith.constant 0 : index
    %c0_34 = arith.constant 0 : index
    %38 = vector.load %arg13[%c0_33, %c0_34] : memref<1x32xf32, #tpu.memory_space<vmem>>, vector<1x32xf32>
    %39 = vector.broadcast %38 : vector<1x32xf32> to vector<8x32xf32>
    %40 = arith.addf %37, %39 : vector<8x32xf32>
    %c0_35 = arith.constant 0 : index
    %c0_36 = arith.constant 0 : index
    %41 = vector.load %arg14[%c0_35, %c0_36] : memref<8x32xf32, #tpu.memory_space<vmem>>, vector<8x32xf32>
    tpu.vector_store %arg14[%c0_35, %c0_36], %40 {strides = array<i32>} : memref<8x32xf32, #tpu.memory_space<vmem>>, vector<8x32xf32>,
    %c0_37 = arith.constant 0 : index
    %c0_38 = arith.constant 0 : index
    %42 = vector.load %arg15[%c0_37, %c0_38] : memref<8x4xf32, #tpu.memory_space<vmem>>, vector<8x4xf32>
    tpu.vector_store %arg15[%c0_37, %c0_38], %21 {strides = array<i32>} : memref<8x4xf32, #tpu.memory_space<vmem>>, vector<8x4xf32>,
    return
  }
  func.func @transform_0(%arg0: i32) -> (i32, i32) {
    %c0_i32 = arith.constant 0 : i32
    %c0_i32_0 = arith.constant 0 : i32
    return %arg0, %c0_i32 : i32, i32
  }
  func.func @transform_1(%arg0: i32) -> (i32, i32) {
    %c0_i32 = arith.constant 0 : i32
    %c0_i32_0 = arith.constant 0 : i32
    %c0_i32_1 = arith.constant 0 : i32
    return %c0_i32, %c0_i32_0 : i32, i32
  }
  func.func @transform_2(%arg0: i32) -> (i32, i32) {
    %c0_i32 = arith.constant 0 : i32
    %c0_i32_0 = arith.constant 0 : i32
    %c0_i32_1 = arith.constant 0 : i32
    return %c0_i32, %c0_i32_0 : i32, i32
  }
  func.func @transform_3(%arg0: i32) -> (i32, i32) {
    %c0_i32 = arith.constant 0 : i32
    %c0_i32_0 = arith.constant 0 : i32
    %c0_i32_1 = arith.constant 0 : i32
    return %c0_i32, %c0_i32_0 : i32, i32
  }
  func.func @transform_4(%arg0: i32) -> (i32, i32) {
    %c0_i32 = arith.constant 0 : i32
    %c0_i32_0 = arith.constant 0 : i32
    %c0_i32_1 = arith.constant 0 : i32
    return %c0_i32, %c0_i32_0 : i32, i32
  }
  func.func @transform_5(%arg0: i32) -> (i32, i32) {
    %c0_i32 = arith.constant 0 : i32
    %c0_i32_0 = arith.constant 0 : i32
    %c0_i32_1 = arith.constant 0 : i32
    return %c0_i32, %c0_i32_0 : i32, i32
  }
  func.func @transform_6(%arg0: i32) -> (i32, i32) {
    %c0_i32 = arith.constant 0 : i32
    %c0_i32_0 = arith.constant 0 : i32
    %c0_i32_1 = arith.constant 0 : i32
    return %c0_i32, %c0_i32_0 : i32, i32
  }
  func.func @transform_7(%arg0: i32) -> (i32, i32) {
    %c0_i32 = arith.constant 0 : i32
    %c0_i32_0 = arith.constant 0 : i32
    %c0_i32_1 = arith.constant 0 : i32
    return %c0_i32, %c0_i32_0 : i32, i32
  }
  func.func @transform_8(%arg0: i32) -> (i32, i32) {
    %c0_i32 = arith.constant 0 : i32
    %c0_i32_0 = arith.constant 0 : i32
    %c0_i32_1 = arith.constant 0 : i32
    return %c0_i32, %c0_i32_0 : i32, i32
  }
  func.func @transform_9(%arg0: i32) -> (i32, i32) {
    %c0_i32 = arith.constant 0 : i32
    %c0_i32_0 = arith.constant 0 : i32
    %c0_i32_1 = arith.constant 0 : i32
    return %c0_i32, %c0_i32_0 : i32, i32
  }
  func.func @transform_10(%arg0: i32) -> (i32, i32) {
    %c0_i32 = arith.constant 0 : i32
    %c0_i32_0 = arith.constant 0 : i32
    %c0_i32_1 = arith.constant 0 : i32
    return %c0_i32, %c0_i32_0 : i32, i32
  }
  func.func @transform_11(%arg0: i32) -> (i32, i32) {
    %c0_i32 = arith.constant 0 : i32
    %c0_i32_0 = arith.constant 0 : i32
    %c0_i32_1 = arith.constant 0 : i32
    return %c0_i32, %c0_i32_0 : i32, i32
  }
  func.func @transform_12(%arg0: i32) -> (i32, i32) {
    %c0_i32 = arith.constant 0 : i32
    %c0_i32_0 = arith.constant 0 : i32
    %c0_i32_1 = arith.constant 0 : i32
    return %c0_i32, %c0_i32_0 : i32, i32
  }
  func.func @transform_13(%arg0: i32) -> (i32, i32) {
    %c0_i32 = arith.constant 0 : i32
    %c0_i32_0 = arith.constant 0 : i32
    return %arg0, %c0_i32 : i32, i32
  }
  func.func @transform_14(%arg0: i32) -> (i32, i32) {
    %c0_i32 = arith.constant 0 : i32
    %c0_i32_0 = arith.constant 0 : i32
    return %arg0, %c0_i32 : i32, i32
  }
}

</mosaic_0001>

<bundles_post_ra>
// kernel: tpu_custom_call.1
= control target key start
LH: loop header
LB: loop body
LE: loop exit
PB: predicated region body
PF: predicated region fallthrough
CT: control target
= control target key end

     0   :  { %vm56_vm0 = vcmask 261120   ;;  %s595_s0 = inlined_call_operand.vmem [shape: f32[8,32], index: 0, kind: input, shape index: {}]   ;;  %s596_s1 = inlined_call_operand.vmem [shape: f32[32,128], index: 1, kind: input, shape index: {}]   ;;  %s597_s2 = inlined_call_operand.vmem [shape: f32[1,128], index: 2, kind: input, shape index: {}]   ;;  %s598_s3 = inlined_call_operand.vmem [shape: f32[128,64], index: 3, kind: input, shape index: {}]   ;;  %s599_s4 = inlined_call_operand.vmem [shape: f32[1,64], index: 4, kind: input, shape index: {}]   ;;  %s600_s5 = inlined_call_operand.vmem [shape: f32[64,4], index: 5, kind: input, shape index: {}]   ;;  %s601_s6 = inlined_call_operand.vmem [shape: f32[1,4], index: 6, kind: input, shape index: {}]   ;;  %s602_s7 = inlined_call_operand.vmem [shape: f32[4,64], index: 7, kind: input, shape index: {}]   ;;  %s603_s8 = inlined_call_operand.vmem [shape: f32[1,64], index: 8, kind: input, shape index: {}]   ;;  %s604_s9 = inlined_call_operand.vmem [shape: f32[64,128], index: 9, kind: input, shape index: {}]   ;;  %s605_s10 = inlined_call_operand.vmem [shape: f32[1,128], index: 10, kind: input, shape index: {}]   ;;  %s606_s11 = inlined_call_operand.vmem [shape: f32[128,32], index: 11, kind: input, shape index: {}]   ;;  %s607_s12 = inlined_call_operand.vmem [shape: f32[1,32], index: 12, kind: input, shape index: {}]   ;;  %s608_s13 = inlined_call_operand.hbm [shape: f32[8,32], index: 13, kind: output, shape index: {0}]   ;;  %s609_s14 = inlined_call_operand.vmem [shape: f32[8,4], index: 14, kind: output, shape index: {1}]  }
   0x1   :  { %v51_v0 = vld [vmem:[%s596_s1 + $0x18] sm:$0xff]  ;;  %v50_v1 = vld [vmem:[%s596_s1 + $0x10] sm:$0xff]  ;;  %v49_v3 = vld [vmem:[%s596_s1 + $0x8] sm:$0xff] }
   0x2   :  { %72 = vmatpush.msra.mxu2 %v51_v0  ;;  %v96_v2 = vld [vmem:[%s598_s3 + $0x78] sm:$0xff]  ;;  %v95_v4 = vld [vmem:[%s598_s3 + $0x70] sm:$0xff]  ;;  %v94_v5 = vld [vmem:[%s598_s3 + $0x68] sm:$0xff] }
   0x3   :  { %101 = vmatpush.msra.mxu1 %v96_v2  ;;  %v48_v6 = vld [vmem:[%s596_s1] sm:$0xff]  ;;  %v92_v9 = vld [vmem:[%s598_s3 + $0x58] sm:$0xff] }
   0x4   :  { %73 = vmatpush.msra.mxu2 %v50_v1  ;;  %v47_v7 = vld [vmem:[%s595_s0] sm:$0xff] }
   0x5   :  { %102 = vmatpush.msra.mxu1 %v95_v4  ;;  %v93_v8 = vld [vmem:[%s598_s3 + $0x60] sm:$0xff] }
   0x6   :  { %74 = vmatpush.msra.mxu2 %v49_v3 }
   0x7   :  { %103 = vmatpush.msra.mxu1 %v94_v5 }
   0x8   :  { %75 = vmatpush.msra.mxu2 %v48_v6 }
   0x9   :  { %291 = vmatmul.msk.f32.vlgmr.msra.gmra.mxu2 %vm56_vm0, %v47_v7  ;;  %104 = vmatpush.msra.mxu1 %v93_v8 }
   0xa   :  { %20 = vsyncpa [#allocation3], 0  ;;  %v91_v10 = vld [vmem:[%s598_s3 + $0x50] sm:$0xff]  ;;  %v90_v11 = vld [vmem:[%s598_s3 + $0x48] sm:$0xff]  ;;  %vm134_vm1 = vcmask 523264   ;;  %vm168_vm2 = vcmask 1043456  }
   0xb   :  { %105 = vmatpush.msra.mxu1 %v92_v9  ;;  %v89_v12 = vld [vmem:[%s598_s3 + $0x40] sm:$0xff]  ;;  %v88_v13 = vld [vmem:[%s598_s3 + $0x38] sm:$0xff]  ;;  %v87_v14 = vld [vmem:[%s598_s3 + $0x30] sm:$0xff]  ;;  %vm164_vm3 = vcmask 31744   ;;  %s329_s24 = smov [#allocation2]  }
   0xc   :  { %v86_v15 = vld [vmem:[%s598_s3 + $0x28] sm:$0xff]  ;;  %v85_v16 = vld [vmem:[%s598_s3 + $0x20] sm:$0xff]  ;;  %v84_v17 = vld [vmem:[%s598_s3 + $0x18] sm:$0xff]  ;;  %s276_s25 = sshll.u32 %s329_s24, 4  ;;  %s277_s25 = int_to_ptr.vmem [resolvable:$true] %s276_s25 }
   0xd   :  { %106 = vmatpush.msra.mxu1 %v91_v10  ;;  %v83_v18 = vld [vmem:[%s598_s3 + $0x10] sm:$0xff]  ;;  %v82_v19 = vld [vmem:[%s598_s3 + $0x8] sm:$0xff]  ;;  %v81_v20 = vld [vmem:[%s598_s3] sm:$0xff]  ;;  %s278_s3 = sshll.u32 %s608_s13, 4  ;;  %s279_s3 = int_to_ptr.hbm [resolvable:$true] %s278_s3 }
   0xe   :  { %v129_v21 = vld [vmem:[%s600_s5 + $0x38] sm:$0xff]  ;;  %v128_v22 = vld [vmem:[%s600_s5 + $0x30] sm:$0xff]  ;;  %v127_v23 = vld [vmem:[%s600_s5 + $0x28] sm:$0xff] }
   0xf   :  { %107 = vmatpush.msra.mxu1 %v90_v11  ;;  %146 = vmatpush.msrb.mxu2 %v129_v21  ;;  %v126_v24 = vld [vmem:[%s600_s5 + $0x20] sm:$0xff]  ;;  %v125_v25 = vld [vmem:[%s600_s5 + $0x18] sm:$0xff]  ;;  %v124_v30 = vld [vmem:[%s600_s5 + $0x10] sm:$0xff] }
  0x10   :  { %v297_v26 = vld [vmem:[%s597_s2] ss:$0 sm:$0xff]  ;;  %v123_v31 = vld [vmem:[%s600_s5 + $0x8] sm:$0xff]  ;;  %v200_v38 = vld [vmem:[%s604_s9 + $0x38] sm:$0xff] }
  0x11   :  { %108 = vmatpush.msra.mxu1 %v89_v12  ;;  %147 = vmatpush.msrb.mxu2 %v128_v22  ;;  %v122_v32 = vld [vmem:[%s600_s5] sm:$0xff]  ;;  %v199_v39 = vld [vmem:[%s604_s9 + $0x30] sm:$0xff]  ;;  %v198_v40 = vld [vmem:[%s604_s9 + $0x28] sm:$0xff] }
  0x12   :  { %v298_v33 = vld [vmem:[%s599_s4] ss:$0 sm:$0xff]  ;;  %v196_v42 = vld [vmem:[%s604_s9 + $0x18] sm:$0xff]  ;;  %v195_v47 = vld [vmem:[%s604_s9 + $0x10] sm:$0xff] }
  0x13   :  { %109 = vmatpush.msra.mxu1 %v88_v13  ;;  %148 = vmatpush.msrb.mxu2 %v127_v23  ;;  %v159_v37 = vld [vmem:[%s602_s7] sm:$0xf]  ;;  %v194_v48 = vld [vmem:[%s604_s9 + $0x8] sm:$0xff]  ;;  %v244_v50 = vld [vmem:[%s606_s11 + $0x78] sm:$0xff] }
  0x14   :  { %293 = vmatpush.msk.msra.mxu3 %vm168_vm2, %v159_v37  ;;  %v197_v41 = vld [vmem:[%s604_s9 + $0x20] sm:$0xff]  ;;  %v243_v51 = vld [vmem:[%s606_s11 + $0x70] sm:$0xff]  ;;  %249 = vmatpush.msra.mxu0 %v244_v50  ;;  %v242_v52 = vld [vmem:[%s606_s11 + $0x68] sm:$0xff] }
  0x15   :  { %110 = vmatpush.msra.mxu1 %v87_v14  ;;  %149 = vmatpush.msrb.mxu2 %v126_v24  ;;  %v299_v43 = vld [vmem:[%s601_s6] ss:$0 sm:$0xff]  ;;  %v240_v54 = vld [vmem:[%s606_s11 + $0x58] sm:$0xff]  ;;  %v239_v55 = vld [vmem:[%s606_s11 + $0x50] sm:$0xff] }
  0x16   :  { %216 = vmatpush.msrb.mxu3 %v200_v38  ;;  %v193_v49 = vld [vmem:[%s604_s9] sm:$0xff]  ;;  %250 = vmatpush.msra.mxu0 %v243_v51  ;;  %v238_v56 = vld [vmem:[%s606_s11 + $0x48] sm:$0xff]  ;;  %v236_v58 = vld [vmem:[%s606_s11 + $0x38] sm:$0xff] }
  0x17   :  { %111 = vmatpush.msra.mxu1 %v86_v15  ;;  %150 = vmatpush.msrb.mxu2 %v125_v25  ;;  %v241_v53 = vld [vmem:[%s606_s11 + $0x60] sm:$0xff]  ;;  %v235_v59 = vld [vmem:[%s606_s11 + $0x30] sm:$0xff]  ;;  %v234_v60 = vld [vmem:[%s606_s11 + $0x28] sm:$0xff] }
  0x18   :  { %217 = vmatpush.msrb.mxu3 %v199_v39  ;;  %251 = vmatpush.msra.mxu0 %v242_v52  ;;  %v237_v57 = vld [vmem:[%s606_s11 + $0x40] sm:$0xff]  ;;  %v232_v62 = vld [vmem:[%s606_s11 + $0x18] sm:$0xff]  ;;  %v231_v3 = vld [vmem:[%s606_s11 + $0x10] sm:$0xff] }
  0x19   :  { %112 = vmatpush.msra.mxu1 %v85_v16  ;;  %151 = vmatpush.msrb.mxu2 %v124_v30  ;;  %v233_v61 = vld [vmem:[%s606_s11 + $0x20] sm:$0xff]  ;;  %v230_v4 = vld [vmem:[%s606_s11 + $0x8] sm:$0xff] }
  0x1a   :  { %218 = vmatpush.msrb.mxu3 %v198_v40  ;;  %252 = vmatpush.msra.mxu0 %v241_v53  ;;  %v300_v63 = vld [vmem:[%s603_s8] ss:$0 sm:$0xff] }
  0x1b   :  { %113 = vmatpush.msra.mxu1 %v84_v17  ;;  %152 = vmatpush.msrb.mxu2 %v123_v31  ;;  %v229_v5 = vld [vmem:[%s606_s11] sm:$0xff] }
  0x1c   :  { %219 = vmatpush.msrb.mxu3 %v197_v41  ;;  %253 = vmatpush.msra.mxu0 %v240_v54  ;;  %v301_v6 = vld [vmem:[%s605_s10] ss:$0 sm:$0xff] }
  0x1d   :  { %114 = vmatpush.msra.mxu1 %v83_v18  ;;  %153 = vmatpush.msrb.mxu2 %v122_v32  ;;  %v302_v10 = vld [vmem:[%s607_s12] ss:$0 sm:$0xff] }
  0x1e   :  { %220 = vmatpush.msrb.mxu3 %v196_v42  ;;  %254 = vmatpush.msra.mxu0 %v239_v55 }
  0x1f   :  { %115 = vmatpush.msra.mxu1 %v82_v19 }
  0x20   :  { %221 = vmatpush.msrb.mxu3 %v195_v47  ;;  %255 = vmatpush.msra.mxu0 %v238_v56 }
  0x21   :  { %116 = vmatpush.msra.mxu1 %v81_v20 }
  0x22   :  { %222 = vmatpush.msrb.mxu3 %v194_v48  ;;  %256 = vmatpush.msra.mxu0 %v237_v57 }
  0x24   :  { %223 = vmatpush.msrb.mxu3 %v193_v49  ;;  %257 = vmatpush.msra.mxu0 %v236_v58 }
  0x26   :  { %258 = vmatpush.msra.mxu0 %v235_v59 }
  0x28   :  { %259 = vmatpush.msra.mxu0 %v234_v60 }
  0x2a   :  { %260 = vmatpush.msra.mxu0 %v233_v61 }
  0x2c   :  { %261 = vmatpush.msra.mxu0 %v232_v62 }
  0x2e   :  { %262 = vmatpush.msra.mxu0 %v231_v3 }
  0x30   :  { %263 = vmatpush.msra.mxu0 %v230_v4 }
  0x32   :  { %264 = vmatpush.msra.mxu0 %v229_v5 }
  0x8c   :  { %v77_v27 = vpop.f32.mrf.mxu2 }
  0x8d   :  { %v78_v28 = vadd.f32 %v297_v26, %v77_v27 }
  0x8f   :  { %v80_v29 = vmax.f32 %v78_v28, 0.0 }
  0x91   :  { %117 = vmatmul.f32.vlgmr.msra.gmra.mxu1 %v80_v29 }
 0x10e   :  { %v118_v34 = vpop.f32.mrf.mxu1 }
 0x10f   :  { %v119_v35 = vadd.f32 %v298_v33, %v118_v34 }
 0x111   :  { %v121_v36 = vmax.f32 %v119_v35, 0.0 }
 0x113   :  { %292 = vmatmul.msk.f32.vlgmr.msrb.gmra.mxu2 %vm134_vm1, %v121_v36 }
 0x196   :  { %v155_v44 = vpop.f32.mrf.mxu2 }
 0x197   :  { %v156_v45 = vadd.f32 %v299_v43, %v155_v44 }
 0x199   :  { %v158_v46 = vmax.f32 %v156_v45, 0.0 }
 0x19b   :  { %294 = vmatmul.msk.f32.vlgmr.msra.gmra.mxu3 %vm164_vm3, %v158_v46  ;;  %270 = vst.msk [vmem:[%s609_s14] sm:$0xff] %vm164_vm3, %v158_v46 }
 0x21e   :  { %v189_v0 = vpop.f32.mrf.mxu3 }
 0x21f   :  { %v190_v1 = vadd.f32 %v300_v63, %v189_v0 }
 0x221   :  { %v192_v2 = vmax.f32 %v190_v1, 0.0 }
 0x223   :  { %295 = vmatmul.msk.f32.vlgmr.msrb.gmra.mxu3 %vm134_vm1, %v192_v2 }
 0x2a6   :  { %v225_v7 = vpop.f32.mrf.mxu3 }
 0x2a7   :  { %v226_v8 = vadd.f32 %v301_v6, %v225_v7 }
 0x2a9   :  { %v228_v9 = vmax.f32 %v226_v8, 0.0 }
 0x2ab   :  { %265 = vmatmul.f32.vlgmr.msra.gmra.mxu0 %v228_v9 }
 0x328   :  { %v266_v11 = vpop.f32.mrf.mxu0 }
 0x329   :  { %v267_v12 = vadd.f32 %v302_v10, %v266_v11 }
 0x32b   :  { %269 = vst.msk [vmem:[#allocation2] sm:$0xff] %vm56_vm0, %v267_v12 }
 0x32c   :  { %281 = dma.vmem_to_hbm [thread:$0]  %s277_s25, 128, %s279_s3, [#allocation3]  }
 0x32d   :  { %327 = dma.done.wait [#allocation3], 128  }
 0x32e   :  { %328 = vsyncadd [#allocation3], 4294967168 }
 0x32f   :  { %290 = vsyncpa [#allocation3], 1 }

</bundles_post_ra>
